<compile_context>
chip_gen: v7x
topology: tpu7x:2x2x1
jax: 0.10.0
libtpu: 0.0.40
codegen_flags: <defaults>
</compile_context>

<pallas_src>
from functools import partial

import jax
import jax.numpy as jnp
from jax.experimental import pallas as pl
from jax.experimental.pallas import tpu as pltpu

VMEM_LIMIT_BYTES = 32 * 1024 * 1024   # explicit scoped-VMEM budget (safe on v5e/v6e/v7x)


def _round_up(x, m):
    return ((x + m - 1) // m) * m


# ----------------------------- Pallas kernels ------------------------------ #

def _conv3x3_bn_kernel(*refs, stride, oh, ow, relu):
    """Fused 3x3 conv (pad=1, `stride`) + folded-BN bias (+ ReLU); one sample per grid step.

    refs = (phase_refs[stride*stride], w_ref, b_ref, o_ref)
      phase_refs[p*stride+q] : (PHp, PWq, Cin) bf16  spatial phase (p, q) of the padded input
      w_ref                  : (9, Cin, Nout)  bf16  weight with BN scale folded into columns
      b_ref                  : (1, Nout)       f32   folded-BN bias
      o_ref                  : (OH, OW, Nout)
    im2col is fused: 9 contiguous shifted windows -> 9 accumulating MXU dots (f32 acc).
    """
    s = stride
    ph_refs = refs[:s * s]
    w_ref, b_ref, o_ref = refs[s * s], refs[s * s + 1], refs[s * s + 2]
    nout = o_ref.shape[-1]

    acc = None
    for kh in range(3):
        for kw in range(3):
            ph_ref = ph_refs[(kh % s) * s + (kw % s)]
            r0, c0 = kh // s, kw // s
            win = ph_ref[r0:r0 + oh, c0:c0 + ow, :]            # (OH, OW, Cin), contiguous
            d = jnp.dot(win.reshape(oh * ow, win.shape[-1]), w_ref[kh * 3 + kw],
                        preferred_element_type=jnp.float32)
            acc = d if acc is None else acc + d
    y = acc + b_ref[...]
    if relu:
        y = jnp.maximum(y, 0.0)
    o_ref[...] = y.reshape(oh, ow, nout).astype(o_ref.dtype)


def _conv3x3_bn_skip_relu_kernel(hp_ref, xs_ref, w_ref, wsk_ref, b_ref, o_ref, *, oh, ow):
    """conv2 (3x3, s=1) + BN2*(1-p)  fused with  skip 1x1-conv + BNs  and the final ReLU.

    hp_ref : (OH+2, OW+2, Cmid) bf16  spatially padded conv1 output
    xs_ref : (OH, OW, Cin)      bf16  stride-subsampled block input (skip path)
    w_ref  : (9, Cmid, Cout)    bf16  conv2 weight, BN2 scale * (1-p) folded in
    wsk_ref: (Cin, Cout)        bf16  skip 1x1 weight, BNs scale folded in
    b_ref  : (1, Cout)          f32   combined bias  b2*(1-p) + bs
    o_ref  : (OH, OW, Cout)
    """
    nout = o_ref.shape[-1]
    # skip path: one more accumulating dot into the same f32 accumulator (no HBM round trip)
    acc = jnp.dot(xs_ref[...].reshape(oh * ow, xs_ref.shape[-1]), wsk_ref[...],
                  preferred_element_type=jnp.float32)
    for kh in range(3):
        for kw in range(3):
            win = hp_ref[kh:kh + oh, kw:kw + ow, :]            # (OH, OW, Cmid), contiguous
            acc += jnp.dot(win.reshape(oh * ow, win.shape[-1]), w_ref[kh * 3 + kw],
                           preferred_element_type=jnp.float32)
    y = jnp.maximum(acc + b_ref[...], 0.0)
    o_ref[...] = y.reshape(oh, ow, nout).astype(o_ref.dtype)


# ------------------------------ wrappers ------------------------------------ #

def _phase_split(xp_nhwc, stride):
    """Space-to-depth phase decomposition (one pass of glue, no traffic amplification)."""
    if stride == 1:
        return (xp_nhwc,)
    return tuple(xp_nhwc[:, p::stride, q::stride, :]
                 for p in range(stride) for q in range(stride))


def conv3x3_bn(xp_nhwc, w9, bias, *, stride, oh, ow, relu, out_dtype):
    """Fused 3x3 conv (input already spatially padded) + bias (+relu), grid over batch."""
    phases = _phase_split(xp_nhwc, stride)
    n = xp_nhwc.shape[0]
    nout = w9.shape[-1]
    in_specs = ([pl.BlockSpec((None,) + p.shape[1:], lambda i: (i, 0, 0, 0))
                 for p in phases]
                + [pl.BlockSpec(w9.shape, lambda i: (0, 0, 0)),
                   pl.BlockSpec(bias.shape, lambda i: (0, 0))])
    return pl.pallas_call(
        partial(_conv3x3_bn_kernel, stride=stride, oh=oh, ow=ow, relu=relu),
        out_shape=jax.ShapeDtypeStruct((n, oh, ow, nout), out_dtype),
        grid=(n,),
        in_specs=in_specs,
        out_specs=pl.BlockSpec((None, oh, ow, nout), lambda i: (i, 0, 0, 0)),
        compiler_params=pltpu.CompilerParams(
            dimension_semantics=("parallel",),
            vmem_limit_bytes=VMEM_LIMIT_BYTES),
    )(*phases, w9, bias)


def conv3x3_bn_skip_relu(hp, xs, w9, wsk, bias, *, oh, ow, out_dtype):
    """Fused conv2 + BN2*(1-p) + skip(1x1 conv + BNs) + ReLU, grid over batch."""
    n = hp.shape[0]
    nout = w9.shape[-1]
    return pl.pallas_call(
        partial(_conv3x3_bn_skip_relu_kernel, oh=oh, ow=ow),
        out_shape=jax.ShapeDtypeStruct((n, oh, ow, nout), out_dtype),
        grid=(n,),
        in_specs=[
            pl.BlockSpec((None,) + hp.shape[1:], lambda i: (i, 0, 0, 0)),
            pl.BlockSpec((None,) + xs.shape[1:], lambda i: (i, 0, 0, 0)),
            pl.BlockSpec(w9.shape, lambda i: (0, 0, 0)),
            pl.BlockSpec(wsk.shape, lambda i: (0, 0)),
            pl.BlockSpec(bias.shape, lambda i: (0, 0)),
        ],
        out_specs=pl.BlockSpec((None, oh, ow, nout), lambda i: (i, 0, 0, 0)),
        compiler_params=pltpu.CompilerParams(
            dimension_semantics=("parallel",),
            vmem_limit_bytes=VMEM_LIMIT_BYTES),
    )(hp, xs, w9, wsk, bias)


# ------------------------------ glue (JAX) ----------------------------------- #

def bn_fold(gamma, beta, mean, var, eps=1e-5):
    scale = gamma / jnp.sqrt(var + eps)
    bias = beta - mean * scale
    return scale, bias


def residual_block_forward(x_nchw, params, *, stride, p_sd):
    """Eval-mode ResidualModule.forward; both convs + BN + skip + ReLU run in Pallas."""
    x = jnp.transpose(x_nchw, (0, 2, 3, 1)).astype(jnp.bfloat16)    # NCHW -> NHWC, bf16 glue
    n, h, w, cin = x.shape
    cout = params["w1"].shape[-1]
    oh = (h - 1) // stride + 1
    ow = (w - 1) // stride + 1
    cin_p = _round_up(cin, 8)          # sublane-aligned K for the conv1 / skip dots
    cmid = _round_up(cout, 8)          # h channel width (= conv2 K); not inflated to 128

    keep = 1.0 - p_sd
    s1, b1 = bn_fold(*params["bn1"])
    s2, b2 = bn_fold(*params["bn2"])
    ss, bs = bn_fold(*params["bns"])

    # fold BN scales (and the eval-mode keep prob) into the bf16 weight columns
    w1 = jnp.pad((params["w1"] * s1).reshape(9, cin, cout),
                 ((0, 0), (0, cin_p - cin), (0, cmid - cout))).astype(jnp.bfloat16)
    w2 = jnp.pad((params["w2"] * (s2 * keep)).reshape(9, cout, cout),
                 ((0, 0), (0, cmid - cout), (0, 0))).astype(jnp.bfloat16)
    wsk = jnp.pad((params["ws"] * ss).reshape(cin, cout),
                  ((0, cin_p - cin), (0, 0))).astype(jnp.bfloat16)
    bias1 = jnp.pad(b1, (0, cmid - cout)).reshape(1, cmid).astype(jnp.float32)
    bias2 = (b2 * keep + bs).reshape(1, cout).astype(jnp.float32)   # conv2 + skip biases merged

    # channel pad once (sublane multiple), then spatial halo pad for conv1 (all bf16)
    x = jnp.pad(x, ((0, 0), (0, 0), (0, 0), (0, cin_p - cin)))
    xp = jnp.pad(x, ((0, 0), (1, 1), (1, 1), (0, 0)))

    # conv1 (3x3, stride) + BN1 + ReLU  ->  bf16 h at cmid channels
    hmid = conv3x3_bn(xp, w1, bias1, stride=stride, oh=oh, ow=ow,
                      relu=True, out_dtype=jnp.bfloat16)

    # conv2 (3x3, s=1) + BN2*(1-p)  fused with  skip (1x1 conv, stride) + BNs, + final ReLU
    hp = jnp.pad(hmid, ((0, 0), (1, 1), (1, 1), (0, 0)))
    xs = x[:, ::stride, ::stride, :]                     # 1x1-conv input (skip path)
    out = conv3x3_bn_skip_relu(hp, xs, w2, wsk, bias2, oh=oh, ow=ow,
                               out_dtype=jnp.float32)
    return jnp.transpose(out, (0, 3, 1, 2))              # NHWC -> NCHW


# ------------------------------ reference ------------------------------------ #

def reference_forward(x_nchw, params, *, stride, p_sd):
    x = jnp.transpose(x_nchw, (0, 2, 3, 1))
    dn = ("NHWC", "HWIO", "NHWC")
    s1, b1 = bn_fold(*params["bn1"])
    s2, b2 = bn_fold(*params["bn2"])
    ss, bs = bn_fold(*params["bns"])
    h = jax.lax.conv_general_dilated(x, params["w1"], (stride, stride),
                                     ((1, 1), (1, 1)), dimension_numbers=dn)
    h = jnp.maximum(h * s1 + b1, 0.0)
    h = jax.lax.conv_general_dilated(h, params["w2"], (1, 1),
                                     ((1, 1), (1, 1)), dimension_numbers=dn)
    h = (h * s2 + b2) * (1.0 - p_sd)
    r = jax.lax.conv_general_dilated(x, params["ws"], (stride, stride),
                                     ((0, 0), (0, 0)), dimension_numbers=dn)
    r = r * ss + bs
    out = jnp.maximum(h + r, 0.0)
    return jnp.transpose(out, (0, 3, 1, 2))


# -------------------------------- main ---------------------------------------- #

if __name__ == "__main__":
    key = jax.random.PRNGKey(0)
    input_dim, output_dim, stride = 4, 8, 2
    p_stochastic_depth = 0.1
    N, H, W = 2, 16, 16

    k_x, k_w1, k_w2, k_ws = jax.random.split(key, 4)
    x = jax.random.normal(k_x, (N, input_dim, H, W), dtype=jnp.float32)  # NCHW like PyTorch

    def kaiming_out(k, shape_hwio):
        kh, kw, _, co = shape_hwio
        std = jnp.sqrt(2.0 / (co * kh * kw))     # kaiming_normal_, mode='fan_out', relu
        return std * jax.random.normal(k, shape_hwio, dtype=jnp.float32)

    def bn_init(c):
        # PyTorch init: weight=1, bias=0; fresh running stats: mean=0, var=1
        return (jnp.ones((c,), jnp.float32), jnp.zeros((c,), jnp.float32),
                jnp.zeros((c,), jnp.float32), jnp.ones((c,), jnp.float32))

    params = {
        "w1": kaiming_out(k_w1, (3, 3, input_dim, output_dim)),
        "w2": kaiming_out(k_w2, (3, 3, output_dim, output_dim)),
        "ws": kaiming_out(k_ws, (1, 1, input_dim, output_dim)),
        "bn1": bn_init(output_dim),
        "bn2": bn_init(output_dim),
        "bns": bn_init(output_dim),
    }

    out = residual_block_forward(x, params, stride=stride, p_sd=p_stochastic_depth)
    out = jax.block_until_ready(out)

    ref = reference_forward(x, params, stride=stride, p_sd=p_stochastic_depth)
    assert out.shape == (N, output_dim, H // stride, W // stride), out.shape
    # bf16 MXU operands / bf16 h -> loosened tolerance vs. the all-f32 reference.
    assert jnp.allclose(out, ref, rtol=5e-2, atol=5e-2), float(jnp.max(jnp.abs(out - ref)))

    print("KERNEL_OK")
</pallas_src>

<mosaic_0001>
module attributes {stable_mosaic.version = 11 : i64} {
  func.func @_conv3x3_bn_kernel(%arg0: i32, %arg1: memref<1x9x9x8xbf16, #tpu.memory_space<vmem>>, %arg2: memref<1x9x9x8xbf16, #tpu.memory_space<vmem>>, %arg3: memref<1x9x9x8xbf16, #tpu.memory_space<vmem>>, %arg4: memref<1x9x9x8xbf16, #tpu.memory_space<vmem>>, %arg5: memref<9x8x8xbf16, #tpu.memory_space<vmem>>, %arg6: memref<1x8xf32, #tpu.memory_space<vmem>>, %arg7: memref<1x8x8x8xbf16, #tpu.memory_space<vmem>>) attributes {dimension_semantics = [#tpu.dimension_semantics<parallel>], iteration_bounds = array<i64: 2>, scalar_prefetch = 0 : i64, scratch_operands = 0 : i64, tpu.core_type = #tpu.core_type<tc>, window_params = [{transform_indices = @transform_0, window_bounds = array<i64: 1, 9, 9, 8>}, {transform_indices = @transform_1, window_bounds = array<i64: 1, 9, 9, 8>}, {transform_indices = @transform_2, window_bounds = array<i64: 1, 9, 9, 8>}, {transform_indices = @transform_3, window_bounds = array<i64: 1, 9, 9, 8>}, {pipeline_mode = #tpu.pipeline_mode<synchronous>, transform_indices = @transform_4, window_bounds = array<i64: 9, 8, 8>}, {pipeline_mode = #tpu.pipeline_mode<synchronous>, transform_indices = @transform_5, window_bounds = array<i64: 1, 8>}, {transform_indices = @transform_6, window_bounds = array<i64: 1, 8, 8, 8>}]} {
    %c0 = arith.constant 0 : index
    %c0_0 = arith.constant 0 : index
    %c0_1 = arith.constant 0 : index
    %c0_2 = arith.constant 0 : index
    %0 = vector.load %arg1[%c0, %c0_0, %c0_1, %c0_2] : memref<1x9x9x8xbf16, #tpu.memory_space<vmem>>, vector<1x8x8x8xbf16>
    %1 = vector.shape_cast %0 : vector<1x8x8x8xbf16> to vector<8x8x8xbf16>
    %2 = vector.shape_cast %1 : vector<8x8x8xbf16> to vector<64x8xbf16>
    %c0_3 = arith.constant 0 : index
    %c0_4 = arith.constant 0 : index
    %c0_5 = arith.constant 0 : index
    %3 = vector.load %arg5[%c0_3, %c0_4, %c0_5] : memref<9x8x8xbf16, #tpu.memory_space<vmem>>, vector<1x8x8xbf16>
    %4 = vector.shape_cast %3 : vector<1x8x8xbf16> to vector<8x8xbf16>
    %cst = arith.constant dense<0.000000e+00> : vector<64x8xf32>
    %5 = tpu.matmul %2, %4, %cst {dimension_numbers = #tpu.dot_dimension_numbers<[1], [0], [0], [1], [0, 0, 1, 1], [], []>} : vector<64x8xbf16>, vector<8x8xbf16>, vector<64x8xf32> -> vector<64x8xf32>
    %c0_6 = arith.constant 0 : index
    %c0_7 = arith.constant 0 : index
    %c0_8 = arith.constant 0 : index
    %c0_9 = arith.constant 0 : index
    %6 = vector.load %arg2[%c0_6, %c0_7, %c0_8, %c0_9] : memref<1x9x9x8xbf16, #tpu.memory_space<vmem>>, vector<1x8x8x8xbf16>
    %7 = vector.shape_cast %6 : vector<1x8x8x8xbf16> to vector<8x8x8xbf16>
    %8 = vector.shape_cast %7 : vector<8x8x8xbf16> to vector<64x8xbf16>
    %c1 = arith.constant 1 : index
    %c0_10 = arith.constant 0 : index
    %c0_11 = arith.constant 0 : index
    %9 = vector.load %arg5[%c1, %c0_10, %c0_11] : memref<9x8x8xbf16, #tpu.memory_space<vmem>>, vector<1x8x8xbf16>
    %10 = vector.shape_cast %9 : vector<1x8x8xbf16> to vector<8x8xbf16>
    %cst_12 = arith.constant dense<0.000000e+00> : vector<64x8xf32>
    %11 = tpu.matmul %8, %10, %cst_12 {dimension_numbers = #tpu.dot_dimension_numbers<[1], [0], [0], [1], [0, 0, 1, 1], [], []>} : vector<64x8xbf16>, vector<8x8xbf16>, vector<64x8xf32> -> vector<64x8xf32>
    %12 = arith.addf %5, %11 : vector<64x8xf32>
    %c0_13 = arith.constant 0 : index
    %c0_14 = arith.constant 0 : index
    %c1_15 = arith.constant 1 : index
    %c0_16 = arith.constant 0 : index
    %13 = vector.load %arg1[%c0_13, %c0_14, %c1_15, %c0_16] : memref<1x9x9x8xbf16, #tpu.memory_space<vmem>>, vector<1x8x8x8xbf16>
    %14 = vector.shape_cast %13 : vector<1x8x8x8xbf16> to vector<8x8x8xbf16>
    %15 = vector.shape_cast %14 : vector<8x8x8xbf16> to vector<64x8xbf16>
    %c2 = arith.constant 2 : index
    %c0_17 = arith.constant 0 : index
    %c0_18 = arith.constant 0 : index
    %16 = vector.load %arg5[%c2, %c0_17, %c0_18] : memref<9x8x8xbf16, #tpu.memory_space<vmem>>, vector<1x8x8xbf16>
    %17 = vector.shape_cast %16 : vector<1x8x8xbf16> to vector<8x8xbf16>
    %cst_19 = arith.constant dense<0.000000e+00> : vector<64x8xf32>
    %18 = tpu.matmul %15, %17, %cst_19 {dimension_numbers = #tpu.dot_dimension_numbers<[1], [0], [0], [1], [0, 0, 1, 1], [], []>} : vector<64x8xbf16>, vector<8x8xbf16>, vector<64x8xf32> -> vector<64x8xf32>
    %19 = arith.addf %12, %18 : vector<64x8xf32>
    %c0_20 = arith.constant 0 : index
    %c0_21 = arith.constant 0 : index
    %c0_22 = arith.constant 0 : index
    %c0_23 = arith.constant 0 : index
    %20 = vector.load %arg3[%c0_20, %c0_21, %c0_22, %c0_23] : memref<1x9x9x8xbf16, #tpu.memory_space<vmem>>, vector<1x8x8x8xbf16>
    %21 = vector.shape_cast %20 : vector<1x8x8x8xbf16> to vector<8x8x8xbf16>
    %22 = vector.shape_cast %21 : vector<8x8x8xbf16> to vector<64x8xbf16>
    %c3 = arith.constant 3 : index
    %c0_24 = arith.constant 0 : index
    %c0_25 = arith.constant 0 : index
    %23 = vector.load %arg5[%c3, %c0_24, %c0_25] : memref<9x8x8xbf16, #tpu.memory_space<vmem>>, vector<1x8x8xbf16>
    %24 = vector.shape_cast %23 : vector<1x8x8xbf16> to vector<8x8xbf16>
    %cst_26 = arith.constant dense<0.000000e+00> : vector<64x8xf32>
    %25 = tpu.matmul %22, %24, %cst_26 {dimension_numbers = #tpu.dot_dimension_numbers<[1], [0], [0], [1], [0, 0, 1, 1], [], []>} : vector<64x8xbf16>, vector<8x8xbf16>, vector<64x8xf32> -> vector<64x8xf32>
    %26 = arith.addf %19, %25 : vector<64x8xf32>
    %c0_27 = arith.constant 0 : index
    %c0_28 = arith.constant 0 : index
    %c0_29 = arith.constant 0 : index
    %c0_30 = arith.constant 0 : index
    %27 = vector.load %arg4[%c0_27, %c0_28, %c0_29, %c0_30] : memref<1x9x9x8xbf16, #tpu.memory_space<vmem>>, vector<1x8x8x8xbf16>
    %28 = vector.shape_cast %27 : vector<1x8x8x8xbf16> to vector<8x8x8xbf16>
    %29 = vector.shape_cast %28 : vector<8x8x8xbf16> to vector<64x8xbf16>
    %c4 = arith.constant 4 : index
    %c0_31 = arith.constant 0 : index
    %c0_32 = arith.constant 0 : index
    %30 = vector.load %arg5[%c4, %c0_31, %c0_32] : memref<9x8x8xbf16, #tpu.memory_space<vmem>>, vector<1x8x8xbf16>
    %31 = vector.shape_cast %30 : vector<1x8x8xbf16> to vector<8x8xbf16>
    %cst_33 = arith.constant dense<0.000000e+00> : vector<64x8xf32>
    %32 = tpu.matmul %29, %31, %cst_33 {dimension_numbers = #tpu.dot_dimension_numbers<[1], [0], [0], [1], [0, 0, 1, 1], [], []>} : vector<64x8xbf16>, vector<8x8xbf16>, vector<64x8xf32> -> vector<64x8xf32>
    %33 = arith.addf %26, %32 : vector<64x8xf32>
    %c0_34 = arith.constant 0 : index
    %c0_35 = arith.constant 0 : index
    %c1_36 = arith.constant 1 : index
    %c0_37 = arith.constant 0 : index
    %34 = vector.load %arg3[%c0_34, %c0_35, %c1_36, %c0_37] : memref<1x9x9x8xbf16, #tpu.memory_space<vmem>>, vector<1x8x8x8xbf16>
    %35 = vector.shape_cast %34 : vector<1x8x8x8xbf16> to vector<8x8x8xbf16>
    %36 = vector.shape_cast %35 : vector<8x8x8xbf16> to vector<64x8xbf16>
    %c5 = arith.constant 5 : index
    %c0_38 = arith.constant 0 : index
    %c0_39 = arith.constant 0 : index
    %37 = vector.load %arg5[%c5, %c0_38, %c0_39] : memref<9x8x8xbf16, #tpu.memory_space<vmem>>, vector<1x8x8xbf16>
    %38 = vector.shape_cast %37 : vector<1x8x8xbf16> to vector<8x8xbf16>
    %cst_40 = arith.constant dense<0.000000e+00> : vector<64x8xf32>
    %39 = tpu.matmul %36, %38, %cst_40 {dimension_numbers = #tpu.dot_dimension_numbers<[1], [0], [0], [1], [0, 0, 1, 1], [], []>} : vector<64x8xbf16>, vector<8x8xbf16>, vector<64x8xf32> -> vector<64x8xf32>
    %40 = arith.addf %33, %39 : vector<64x8xf32>
    %c0_41 = arith.constant 0 : index
    %c1_42 = arith.constant 1 : index
    %c0_43 = arith.constant 0 : index
    %c0_44 = arith.constant 0 : index
    %41 = vector.load %arg1[%c0_41, %c1_42, %c0_43, %c0_44] : memref<1x9x9x8xbf16, #tpu.memory_space<vmem>>, vector<1x8x8x8xbf16>
    %42 = vector.shape_cast %41 : vector<1x8x8x8xbf16> to vector<8x8x8xbf16>
    %43 = vector.shape_cast %42 : vector<8x8x8xbf16> to vector<64x8xbf16>
    %c6 = arith.constant 6 : index
    %c0_45 = arith.constant 0 : index
    %c0_46 = arith.constant 0 : index
    %44 = vector.load %arg5[%c6, %c0_45, %c0_46] : memref<9x8x8xbf16, #tpu.memory_space<vmem>>, vector<1x8x8xbf16>
    %45 = vector.shape_cast %44 : vector<1x8x8xbf16> to vector<8x8xbf16>
    %cst_47 = arith.constant dense<0.000000e+00> : vector<64x8xf32>
    %46 = tpu.matmul %43, %45, %cst_47 {dimension_numbers = #tpu.dot_dimension_numbers<[1], [0], [0], [1], [0, 0, 1, 1], [], []>} : vector<64x8xbf16>, vector<8x8xbf16>, vector<64x8xf32> -> vector<64x8xf32>
    %47 = arith.addf %40, %46 : vector<64x8xf32>
    %c0_48 = arith.constant 0 : index
    %c1_49 = arith.constant 1 : index
    %c0_50 = arith.constant 0 : index
    %c0_51 = arith.constant 0 : index
    %48 = vector.load %arg2[%c0_48, %c1_49, %c0_50, %c0_51] : memref<1x9x9x8xbf16, #tpu.memory_space<vmem>>, vector<1x8x8x8xbf16>
    %49 = vector.shape_cast %48 : vector<1x8x8x8xbf16> to vector<8x8x8xbf16>
    %50 = vector.shape_cast %49 : vector<8x8x8xbf16> to vector<64x8xbf16>
    %c7 = arith.constant 7 : index
    %c0_52 = arith.constant 0 : index
    %c0_53 = arith.constant 0 : index
    %51 = vector.load %arg5[%c7, %c0_52, %c0_53] : memref<9x8x8xbf16, #tpu.memory_space<vmem>>, vector<1x8x8xbf16>
    %52 = vector.shape_cast %51 : vector<1x8x8xbf16> to vector<8x8xbf16>
    %cst_54 = arith.constant dense<0.000000e+00> : vector<64x8xf32>
    %53 = tpu.matmul %50, %52, %cst_54 {dimension_numbers = #tpu.dot_dimension_numbers<[1], [0], [0], [1], [0, 0, 1, 1], [], []>} : vector<64x8xbf16>, vector<8x8xbf16>, vector<64x8xf32> -> vector<64x8xf32>
    %54 = arith.addf %47, %53 : vector<64x8xf32>
    %c0_55 = arith.constant 0 : index
    %c1_56 = arith.constant 1 : index
    %c1_57 = arith.constant 1 : index
    %c0_58 = arith.constant 0 : index
    %55 = vector.load %arg1[%c0_55, %c1_56, %c1_57, %c0_58] : memref<1x9x9x8xbf16, #tpu.memory_space<vmem>>, vector<1x8x8x8xbf16>
    %56 = vector.shape_cast %55 : vector<1x8x8x8xbf16> to vector<8x8x8xbf16>
    %57 = vector.shape_cast %56 : vector<8x8x8xbf16> to vector<64x8xbf16>
    %c8 = arith.constant 8 : index
    %c0_59 = arith.constant 0 : index
    %c0_60 = arith.constant 0 : index
    %58 = vector.load %arg5[%c8, %c0_59, %c0_60] : memref<9x8x8xbf16, #tpu.memory_space<vmem>>, vector<1x8x8xbf16>
    %59 = vector.shape_cast %58 : vector<1x8x8xbf16> to vector<8x8xbf16>
    %cst_61 = arith.constant dense<0.000000e+00> : vector<64x8xf32>
    %60 = tpu.matmul %57, %59, %cst_61 {dimension_numbers = #tpu.dot_dimension_numbers<[1], [0], [0], [1], [0, 0, 1, 1], [], []>} : vector<64x8xbf16>, vector<8x8xbf16>, vector<64x8xf32> -> vector<64x8xf32>
    %61 = arith.addf %54, %60 : vector<64x8xf32>
    %c0_62 = arith.constant 0 : index
    %c0_63 = arith.constant 0 : index
    %62 = vector.load %arg6[%c0_62, %c0_63] : memref<1x8xf32, #tpu.memory_space<vmem>>, vector<1x8xf32>
    %63 = vector.broadcast %62 : vector<1x8xf32> to vector<64x8xf32>
    %64 = arith.addf %61, %63 : vector<64x8xf32>
    %cst_64 = arith.constant 0.000000e+00 : f32
    %65 = vector.broadcast %cst_64 : f32 to vector<64x8xf32>
    %66 = arith.maximumf %64, %65 : vector<64x8xf32>
    %67 = vector.shape_cast %66 : vector<64x8xf32> to vector<8x8x8xf32>
    %68 = arith.truncf %67 : vector<8x8x8xf32> to vector<8x8x8xbf16>
    %c0_65 = arith.constant 0 : index
    %c0_66 = arith.constant 0 : index
    %c0_67 = arith.constant 0 : index
    %c0_68 = arith.constant 0 : index
    %69 = vector.load %arg7[%c0_65, %c0_66, %c0_67, %c0_68] : memref<1x8x8x8xbf16, #tpu.memory_space<vmem>>, vector<1x8x8x8xbf16>
    %70 = vector.shape_cast %69 : vector<1x8x8x8xbf16> to vector<8x8x8xbf16>
    %71 = vector.shape_cast %68 : vector<8x8x8xbf16> to vector<1x8x8x8xbf16>
    tpu.vector_store %arg7[%c0_65, %c0_66, %c0_67, %c0_68], %71 {strides = array<i32>} : memref<1x8x8x8xbf16, #tpu.memory_space<vmem>>, vector<1x8x8x8xbf16>,
    return
  }
  func.func @transform_0(%arg0: i32) -> (i32, i32, i32, i32) {
    %c0_i32 = arith.constant 0 : i32
    %c0_i32_0 = arith.constant 0 : i32
    %c0_i32_1 = arith.constant 0 : i32
    %c0_i32_2 = arith.constant 0 : i32
    return %arg0, %c0_i32, %c0_i32_0, %c0_i32_1 : i32, i32, i32, i32
  }
  func.func @transform_1(%arg0: i32) -> (i32, i32, i32, i32) {
    %c0_i32 = arith.constant 0 : i32
    %c0_i32_0 = arith.constant 0 : i32
    %c0_i32_1 = arith.constant 0 : i32
    %c0_i32_2 = arith.constant 0 : i32
    return %arg0, %c0_i32, %c0_i32_0, %c0_i32_1 : i32, i32, i32, i32
  }
  func.func @transform_2(%arg0: i32) -> (i32, i32, i32, i32) {
    %c0_i32 = arith.constant 0 : i32
    %c0_i32_0 = arith.constant 0 : i32
    %c0_i32_1 = arith.constant 0 : i32
    %c0_i32_2 = arith.constant 0 : i32
    return %arg0, %c0_i32, %c0_i32_0, %c0_i32_1 : i32, i32, i32, i32
  }
  func.func @transform_3(%arg0: i32) -> (i32, i32, i32, i32) {
    %c0_i32 = arith.constant 0 : i32
    %c0_i32_0 = arith.constant 0 : i32
    %c0_i32_1 = arith.constant 0 : i32
    %c0_i32_2 = arith.constant 0 : i32
    return %arg0, %c0_i32, %c0_i32_0, %c0_i32_1 : i32, i32, i32, i32
  }
  func.func @transform_4(%arg0: i32) -> (i32, i32, i32) {
    %c0_i32 = arith.constant 0 : i32
    %c0_i32_0 = arith.constant 0 : i32
    %c0_i32_1 = arith.constant 0 : i32
    %c0_i32_2 = arith.constant 0 : i32
    return %c0_i32, %c0_i32_0, %c0_i32_1 : i32, i32, i32
  }
  func.func @transform_5(%arg0: i32) -> (i32, i32) {
    %c0_i32 = arith.constant 0 : i32
    %c0_i32_0 = arith.constant 0 : i32
    %c0_i32_1 = arith.constant 0 : i32
    return %c0_i32, %c0_i32_0 : i32, i32
  }
  func.func @transform_6(%arg0: i32) -> (i32, i32, i32, i32) {
    %c0_i32 = arith.constant 0 : i32
    %c0_i32_0 = arith.constant 0 : i32
    %c0_i32_1 = arith.constant 0 : i32
    %c0_i32_2 = arith.constant 0 : i32
    return %arg0, %c0_i32, %c0_i32_0, %c0_i32_1 : i32, i32, i32, i32
  }
}

</mosaic_0001>

<bundles_post_ra>
// kernel: tpu_custom_call.1
= control target key start
LH: loop header
LB: loop body
LE: loop exit
PB: predicated region body
PF: predicated region fallthrough
CT: control target
= control target key end

     0   :  { %11 = vsyncpa [#allocation3], 0  ;;  %s2745_s0 = inlined_call_operand.vmem [shape: bf16[2,9,9,8], index: 0, kind: input, shape index: {}]   ;;  %s2746_s1 = inlined_call_operand.vmem [shape: bf16[2,9,9,8], index: 1, kind: input, shape index: {}]   ;;  %s2747_s2 = inlined_call_operand.vmem [shape: bf16[2,9,9,8], index: 2, kind: input, shape index: {}]   ;;  %s2748_s3 = inlined_call_operand.vmem [shape: bf16[2,9,9,8], index: 3, kind: input, shape index: {}]   ;;  %s2749_s4 = inlined_call_operand.vmem [shape: bf16[9,8,8], index: 4, kind: input, shape index: {}]   ;;  %s2750_s5 = inlined_call_operand.vmem [shape: f32[1,8], index: 5, kind: input, shape index: {}]   ;;  %s2751_s6 = inlined_call_operand.hbm [shape: bf16[2,8,8,8], index: 6, kind: output, shape index: {}]  }
   0x1   :  { %13 = vsyncpa [#allocation3 + $0x1], 0  ;;  %s2358_s21 = smov 0   ;;  %s2360_s22 = smov 0  }
   0x2   :  { %s2362_s23 = smov 0   ;;  %s2364_s24 = smov 0  }
   0x3 LB: > { %s2379_s25 = sadd.s32 4294967295, %s2318_s24   ;;  %s1851_s26 = sadd.s32 4294967294, %s2318_s24   ;;  %s2318_s24 = sphi %s2364_s24, %s2759_s24   ;;  %s2314_s23 = sphi %s2362_s23, %s2758_s23   ;;  %s2310_s22 = sphi %s2360_s22, %s2757_s22   ;;  %s2306_s21 = sphi %s2358_s21, %s2756_s21  }
   0x4   : > { %s2383_s27 = sadd.s32 1, %s2318_s24   ;;  %s172_s28 = sadd.s32 1, %s2314_s23 }
   0x5   : > { %s169_s29 = ssub.s32 %s2318_s24, %s2383_s27  ;;  %p182_p0 = scmp.ne.s32.totalorder %s2314_s23, %s2310_s22 }
   0x6   : > { %p170_p1 = scmp.eq.s32.totalorder %s169_s29, 0  ;;  %p183_p2 = scmp.eq.s32.totalorder %s2379_s25, 1 }
   0x7   : > { %p188_p3 = scmp.ne.s32.totalorder %s2310_s22, %s2306_s21  ;;  %p189_p4 = scmp.eq.s32.totalorder %s1851_s26, 1 }
   0x8   : > { %s2394_s30 = scalar_select %p170_p1, %s2314_s23, %s172_s28  }
   0x9   : > { %p2396_p5 = por %p183_p2, %p182_p0  ;;  %p2400_p6 = por %p189_p4, %p188_p3 }
   0xa   : > { %p1854_p7 = scmp.ge.s32.totalorder %s2318_s24, 1  ;;  %p245_p8 = scmp.lt.s32.totalorder %s2318_s24, 3 }
   0xc   : > { %p246_p9 = pnand %p1854_p7, %p245_p8 }
   0xd   : > { %v1860_v0 = vld [vmem:[%s2749_s4 + $0x4] sm:$0xf] (!%p246_p9)  ;;  %vm363_vm0 = vcmask (!%p246_p9), 1043456   ;;  %v2412_v1 = vld [vmem:[%s2749_s4 + $0x10] sm:$0xf] (!%p246_p9)  ;;  %p290_p10 = scmp.lt.s32.totalorder (!%p246_p9), %s2379_s25, 1 }
   0xe   : > { %249 = sbr.rel (%p246_p9) target bundleno = 341 (0x155), region = 44  ;;  %2180 = vmatprep.subr.msk.bf16.mxu1 (!%p246_p9), %vm363_vm0, %v1860_v0  ;;  %2184 = vmatprep.subr.msk.bf16.mxu0 (!%p246_p9), %vm363_vm0, %v2412_v1  ;;  %v365_v2 = vsel (!%p246_p9), %vm363_vm0, %v1860_v0, 0  ;;  %v2421_v3 = vsel (!%p246_p9), %vm363_vm0, %v2412_v1, 0  ;;  %v319_v4 = vld [vmem:[%s2749_s4] sm:$0xf] (!%p246_p9)  ;;  %vm350_vm1 = vcmask (!%p246_p9), 64512  }
   0xf   : > { %2025 = vmatpush3.bf16.msra.mxu1 (!%p246_p9), %v365_v2  ;;  %2065 = vmatpush3.bf16.msra.mxu0 (!%p246_p9), %v2421_v3  ;;  %v1904_v5 = vld [vmem:[%s2749_s4 + $0x14] sm:$0xf] (!%p246_p9)  ;;  %v465_v6 = vsel (!%p246_p9), %vm363_vm0, %v319_v4, 0  ;;  %v1921_v9 = vld [vmem:[%s2749_s4 + $0x18] sm:$0xf] (!%p246_p9)  ;;  %vm1730_vm5 = vcmask (!%p246_p9), 60416  }
  0x10   : > { %2181 = vmatprep.subr.msk.bf16.mxu1 (!%p246_p9), %vm363_vm0, %v319_v4  ;;  %2186 = vmatprep.subr.msk.bf16.mxu0 (!%p246_p9), %vm363_vm0, %v1904_v5  ;;  %v1156_v7 = vsel (!%p246_p9), %vm363_vm0, %v1904_v5, 0  ;;  %v1877_v10 = vld [vmem:[%s2749_s4 + $0x8] sm:$0xf] (!%p246_p9)  ;;  %vm548_vm2 = vsmask.f32 (!%p246_p9), 3328  ;;  %v2471_v15 = vsel (!%p246_p9), %vm363_vm0, %v1921_v9, 0 }
  0x11   : > { %vm549_vm3 = vsmask.f32 (!%p246_p9), 7440  ;;  %v2474_v16 = vsel (!%p246_p9), %vm363_vm0, %v1877_v10, 0  ;;  %s2320_s29 = smov (!%p246_p9), [#allocation2]  }
  0x12   : > { %vm2497_vm4 = vmor (!%p246_p9), %vm548_vm2, %vm549_vm3  ;;  %s2260_s10 = sshll.u32 (!%p246_p9), %s2320_s29, 4  ;;  %s2261_s10 = int_to_ptr.vmem [resolvable:$false] %s2260_s10 }
  0x13   : > { %s2262_s11 = scalar_lea.vmem (!%p246_p9), %s2261_s10, 1024 }
  0x15   : > { %s291_s15 = scalar_select %p290_p10, %s2379_s25, 1 }
  0x17   : > { %s2433_s18 = smul.u32 72, %s291_s15 }
  0x19   : > { %s2439_s26 = scalar_lea.vmem %s2746_s1, %s2433_s18  ;;  %s2448_s9 = scalar_lea.vmem %s2748_s3, %s2433_s18 }
  0x1a   : > { %v2232_v8 = vld [vmem:[%s2439_s26] ss:$8 sps:$4 sm:$0xff]   ;;  %v2234_v12 = vld [vmem:[%s2439_s26 + $0x10] ss:$8 sps:$4 sm:$0xff]   ;;  %s2463_s16 = scalar_lea.vmem %s2747_s2, %s2433_s18  ;;  %s2491_s20 = scalar_lea.vmem %s2745_s0, %s2433_s18 }
  0x1b   : > { %v2233_v11 = vld [vmem:[%s2448_s9] ss:$8 sps:$4 sm:$0xff]   ;;  %2026 = vmatprep.mubr.msk.bf16.mxu1 %vm350_vm1, %v2232_v8  ;;  %v2235_v13 = vld [vmem:[%s2448_s9 + $0x10] ss:$8 sps:$4 sm:$0xff]   ;;  %v1002_v19 = vld [vmem:[%s2463_s16 + $0x4] sm:$0x1] }
  0x1c   : > { %2066 = vmatprep.mubr.msk.bf16.mxu0 %vm350_vm1, %v2233_v11  ;;  %2027 = vmatmul.mubr.msk.bf16.vlgmr.msra.gmra.mrb[0].mxu1 %vm350_vm1, %v2234_v12  ;;  %v2236_v14 = vld [vmem:[%s2439_s26 + $0x20] ss:$8 sps:$4 sm:$0xff]   ;;  %v2237_v17 = vld [vmem:[%s2439_s26 + $0x30] ss:$8 sps:$4 sm:$0xff]   ;;  %v1004_v21 = vld [vmem:[%s2463_s16 + $0xc] sm:$0x1] }
  0x1d   : > { %2035 = vmatpush3.bf16.msra.mxu1 %v465_v6  ;;  %2067 = vmatmul.mubr.msk.bf16.vlgmr.msra.gmra.mrb[0].mxu0 %vm350_vm1, %v2235_v13  ;;  %v1001_v18 = vld [vmem:[%s2463_s16] sm:$0xf]  ;;  %v1003_v20 = vld [vmem:[%s2463_s16 + $0x8] sm:$0xf]  ;;  %v1027_v24 = vshll.u32 %v1002_v19, 16  ;;  %v1041_v27 = vshll.u32 %v1004_v21, 16 }
  0x1e   : > { %2075 = vmatpush3.bf16.msra.mxu0 %v1156_v7  ;;  %2030 = vmatprep.mubr.msk.bf16.mxu1 %vm350_vm1, %v2236_v14  ;;  %v1018_v22 = vshrl.u32 %v1001_v18, 16  ;;  %v1021_v23 = vshll.u32 %v1001_v18, 16  ;;  %v1032_v25 = vshrl.u32 %v1003_v20, 16  ;;  %v1035_v26 = vshll.u32 %v1003_v20, 16  ;;  %v1005_v28 = vld [vmem:[%s2463_s16 + $0x10] sm:$0xf] }
  0x1f   : > { %2187 = vmatprep.subr.msk.bf16.mxu0 %vm363_vm0, %v1921_v9  ;;  %2182 = vmatprep.subr.msk.bf16.mxu1 %vm363_vm0, %v1877_v10  ;;  %v1006_v29 = vld [vmem:[%s2463_s16 + $0x14] sm:$0x1]  ;;  %v1029_v32 = vrot.slane %v1027_v24, 5  ;;  %v1007_v34 = vld [vmem:[%s2463_s16 + $0x18] sm:$0xf]  ;;  %v1043_v36 = vrot.slane %v1041_v27, 5 }
  0x20   : > { %v1020_v30 = vrot.slane %v1018_v22, 4  ;;  %v1023_v31 = vrot.slane %v1021_v23, 5  ;;  %v1034_v33 = vrot.slane %v1032_v25, 4  ;;  %v1037_v35 = vrot.slane %v1035_v26, 5  ;;  %v1008_v37 = vld [vmem:[%s2463_s16 + $0x1c] sm:$0x1] }
  0x21   : > { %v1046_v38 = vshrl.u32 %v1005_v28, 16  ;;  %v1049_v39 = vshll.u32 %v1005_v28, 16  ;;  %v1055_v41 = vshll.u32 %v1006_v29, 16  ;;  %v1060_v42 = vshrl.u32 %v1007_v34, 16  ;;  %v2238_v53 = vld [vmem:[%s2491_s20] ss:$8 sps:$4 sm:$0xff]  }
  0x22   : > { %v1024_v40 = vor.u32 %v1023_v31, %v1020_v30  ;;  %v1063_v43 = vshll.u32 %v1007_v34, 16  ;;  %v1038_v45 = vor.u32 %v1037_v35, %v1034_v33  ;;  %v1069_v48 = vshll.u32 %v1008_v37, 16  ;;  %v2239_v59 = vld [vmem:[%s2491_s20 + $0x10] ss:$8 sps:$4 sm:$0xff]   ;;  %v1009_v60 = vld [vmem:[%s2463_s16 + $0x20] sm:$0xf] }
  0x23   : > { %v1048_v46 = vrot.slane %v1046_v38, 4  ;;  %v1051_v47 = vrot.slane %v1049_v39, 5  ;;  %v1057_v50 = vrot.slane %v1055_v41, 5  ;;  %v1062_v51 = vrot.slane %v1060_v42, 4  ;;  %v1010_v61 = vld [vmem:[%s2463_s16 + $0x24] sm:$0x1] }
  0x24   : > { %2031 = vmatmul.mubr.msk.bf16.gmra.mrb[4].mxu1 %vm350_vm1, %v2237_v17  ;;  %v1025_v49 = vrot.slane %v1024_v40, 4  ;;  %v1065_v52 = vrot.slane %v1063_v43, 5  ;;  %v1039_v54 = vrot.slane %v1038_v45, 4  ;;  %v1071_v56 = vrot.slane %v1069_v48, 5  ;;  %v1011_v0 = vld [vmem:[%s2463_s16 + $0x28] sm:$0xf] }
  0x25   : > { %v1052_v55 = vor.u32 %v1051_v47, %v1048_v46  ;;  %2036 = vmatprep.mubr.msk.bf16.mxu1 %vm350_vm1, %v2238_v53  ;;  %v1012_v2 = vld [vmem:[%s2463_s16 + $0x2c] sm:$0x1]  ;;  %v1074_v4 = vshrl.u32 %v1009_v60, 16  ;;  %v1077_v7 = vshll.u32 %v1009_v60, 16  ;;  %v1083_v8 = vshll.u32 %v1010_v61, 16 }
  0x26   : > { %v1030_v57 = vsel %vm2497_vm4, %v1025_v49, %v1029_v32  ;;  %v1066_v58 = vor.u32 %v1065_v52, %v1062_v51  ;;  %v1044_v62 = vsel %vm2497_vm4, %v1039_v54, %v1043_v36  ;;  %v1013_v9 = vld [vmem:[%s2463_s16 + $0x30] sm:$0xf]  ;;  %v2516_v10 = vld [vmem:[%s2749_s4 + $0xc] sm:$0xf]  ;;  %v1088_v13 = vshrl.u32 %v1011_v0, 16 }
  0x27   : > { %v1053_v63 = vrot.slane %v1052_v55, 4  ;;  %v1905_v5 = vcombine.low %v1030_v57, %v1044_v62  ;;  %v1076_v12 = vrot.slane %v1074_v4, 4  ;;  %v1091_v14 = vshll.u32 %v1011_v0, 16  ;;  %v1014_v17 = vld [vmem:[%s2463_s16 + $0x34] sm:$0x1] }
  0x28   : > { %v1067_v6 = vrot.slane %v1066_v58, 4  ;;  %v1079_v19 = vrot.slane %v1077_v7, 5  ;;  %v1085_v20 = vrot.slane %v1083_v8, 5  ;;  %v1097_v21 = vshll.u32 %v1012_v2, 16  ;;  %v1015_v22 = vld [vmem:[%s2463_s16 + $0x38] sm:$0xf] }
  0x29   : > { %v1058_v11 = vsel %vm2497_vm4, %v1053_v63, %v1057_v50  ;;  %2076 = vmatprep.mubr.msk.bf16.mxu0 %vm350_vm1, %v1905_v5  ;;  %v2528_v23 = vld [vmem:[%s2749_s4 + $0x1c] sm:$0xf]  ;;  %v1090_v25 = vrot.slane %v1088_v13, 4  ;;  %v1093_v26 = vrot.slane %v1091_v14, 5  ;;  %v1102_v28 = vshrl.u32 %v1013_v9, 16 }
  0x2a   : > { %v1072_v18 = vsel %vm2497_vm4, %v1067_v6, %v1071_v56  ;;  %v1016_v27 = vld [vmem:[%s2463_s16 + $0x3c] sm:$0x1]  ;;  %v1080_v29 = vor.u32 %v1079_v19, %v1076_v12  ;;  %v1099_v30 = vrot.slane %v1097_v21, 5  ;;  %v1105_v31 = vshll.u32 %v1013_v9, 16  ;;  %v2242_v53 = vld [vmem:[%s2491_s20 + $0x8] ss:$8 sps:$4 sm:$0xff]  }
  0x2b   : > { %v1906_v24 = vcombine.low %v1058_v11, %v1072_v18  ;;  %v1111_v32 = vshll.u32 %v1014_v17, 16  ;;  %v1094_v33 = vor.u32 %v1093_v26, %v1090_v25  ;;  %v1104_v34 = vrot.slane %v1102_v28, 4  ;;  %v532_v54 = vld [vmem:[%s2491_s20] sm:$0xf]  ;;  %v533_v56 = vld [vmem:[%s2491_s20 + $0x4] sm:$0x1] }
  0x2c   : > { %2037 = vmatmul.mubr.msk.bf16.vlgmr.msra.gmra.mrb[0].mxu1 %vm350_vm1, %v2239_v59  ;;  %v1116_v35 = vshrl.u32 %v1015_v22, 16  ;;  %v1119_v36 = vshll.u32 %v1015_v22, 16  ;;  %v1081_v37 = vrot.slane %v1080_v29, 4  ;;  %v1107_v38 = vrot.slane %v1105_v31, 5  ;;  %v534_v57 = vld [vmem:[%s2491_s20 + $0x8] sm:$0xf] }
  0x2d   : > { %2045 = vmatpush3.bf16.msra.mxu1 %v2474_v16  ;;  %2077 = vmatmul.mubr.msk.bf16.vlgmr.msra.gmra.mrb[0].mxu0 %vm350_vm1, %v1906_v24  ;;  %v1125_v39 = vshll.u32 %v1016_v27, 16  ;;  %v2240_v16 = vld [vmem:[%s2491_s20 + $0x20] ss:$8 sps:$4 sm:$0xff]   ;;  %v1095_v40 = vrot.slane %v1094_v33, 4  ;;  %v1113_v46 = vrot.slane %v1111_v32, 5  ;;  %v552_v60 = vshrl.u32 %v532_v54, 16 }
  0x2e   : > { %2183 = vmatprep.subr.msk.bf16.mxu1 %vm363_vm0, %v2516_v10  ;;  %2085 = vmatpush3.bf16.msra.mxu0 %v2471_v15  ;;  %v1118_v41 = vrot.slane %v1116_v35, 4  ;;  %v1121_v42 = vrot.slane %v1119_v36, 5  ;;  %v1086_v43 = vsel %vm2497_vm4, %v1081_v37, %v1085_v20  ;;  %v1108_v45 = vor.u32 %v1107_v38, %v1104_v34  ;;  %v2241_v15 = vld [vmem:[%s2491_s20 + $0x30] ss:$8 sps:$4 sm:$0xff]   ;;  %v535_v58 = vld [vmem:[%s2491_s20 + $0xc] sm:$0x1] }
  0x2f   : > { %2188 = vmatprep.subr.msk.bf16.mxu0 %vm363_vm0, %v2528_v23  ;;  %2040 = vmatprep.mubr.msk.bf16.mxu1 %vm350_vm1, %v2240_v16  ;;  %v1100_v47 = vsel %vm2497_vm4, %v1095_v40, %v1099_v30  ;;  %v1127_v49 = vrot.slane %v1125_v39, 5  ;;  %v555_v61 = vshll.u32 %v532_v54, 16  ;;  %v561_v62 = vshll.u32 %v533_v56, 16  ;;  %v536_v63 = vld [vmem:[%s2491_s20 + $0x10] sm:$0xf] }
  0x30   : > { %v1122_v48 = vor.u32 %v1121_v42, %v1118_v41  ;;  %v1907_v50 = vcombine.low %v1086_v43, %v1100_v47  ;;  %v1109_v51 = vrot.slane %v1108_v45, 4  ;;  %v566_v2 = vshrl.u32 %v534_v57, 16  ;;  %v537_v6 = vld [vmem:[%s2491_s20 + $0x14] sm:$0x1]  ;;  %v538_v11 = vld [vmem:[%s2491_s20 + $0x18] sm:$0xf] }
  0x31   : > { %v569_v4 = vshll.u32 %v534_v57, 16  ;;  %v575_v5 = vshll.u32 %v535_v58, 16  ;;  %v554_v7 = vrot.slane %v552_v60, 4  ;;  %v557_v8 = vrot.slane %v555_v61, 5  ;;  %v539_v18 = vld [vmem:[%s2491_s20 + $0x1c] sm:$0x1] }
  0x32   : > { %v1123_v52 = vrot.slane %v1122_v48, 4  ;;  %2080 = vmatprep.mubr.msk.bf16.mxu0 %vm350_vm1, %v1907_v50  ;;  %v1114_v55 = vsel %vm2497_vm4, %v1109_v51, %v1113_v46  ;;  %v563_v9 = vrot.slane %v561_v62, 5  ;;  %v580_v12 = vshrl.u32 %v536_v63, 16  ;;  %v2243_v29 = vld [vmem:[%s2491_s20 + $0x18] ss:$8 sps:$4 sm:$0xff]  }
  0x33   : > { %v568_v13 = vrot.slane %v566_v2, 4  ;;  %v571_v14 = vrot.slane %v569_v4, 5  ;;  %v577_v17 = vrot.slane %v575_v5, 5  ;;  %v583_v19 = vshll.u32 %v536_v63, 16  ;;  %v2244_v37 = vld [vmem:[%s2491_s20 + $0x28] ss:$8 sps:$4 sm:$0xff]  }
  0x34   : > { %2041 = vmatmul.mubr.msk.bf16.gmra.mrb[4].mxu1 %vm350_vm1, %v2241_v15  ;;  %v1128_v59 = vsel %vm2497_vm4, %v1123_v52, %v1127_v49  ;;  %v558_v20 = vor.u32 %v557_v8, %v554_v7  ;;  %v582_v21 = vrot.slane %v580_v12, 4  ;;  %v589_v22 = vshll.u32 %v537_v6, 16  ;;  %v540_v40 = vld [vmem:[%s2491_s20 + $0x20] sm:$0xf]  ;;  %v541_v45 = vld [vmem:[%s2491_s20 + $0x24] sm:$0x1] }
  0x35   : > { %v1908_v0 = vcombine.low %v1114_v55, %v1128_v59  ;;  %v594_v24 = vshrl.u32 %v538_v11, 16  ;;  %v572_v25 = vor.u32 %v571_v14, %v568_v13  ;;  %v585_v26 = vrot.slane %v583_v19, 5  ;;  %v542_v46 = vld [vmem:[%s2491_s20 + $0x28] sm:$0xf]  ;;  %v543_v48 = vld [vmem:[%s2491_s20 + $0x2c] sm:$0x1] }
  0x36   : > { %v597_v27 = vshll.u32 %v538_v11, 16  ;;  %v603_v28 = vshll.u32 %v539_v18, 16  ;;  %v1394_v30 = vsel %vm363_vm0, %v2528_v23, 0  ;;  %v559_v31 = vrot.slane %v558_v20, 4  ;;  %v2575_v23 = vld [vmem:[%s2749_s4 + $0x20] sm:$0xf] }
  0x37   : > { %2081 = vmatmul.mubr.msk.bf16.gmra.mrb[4].mxu0 %vm350_vm1, %v1908_v0  ;;  %v591_v32 = vrot.slane %v589_v22, 5  ;;  %v596_v33 = vrot.slane %v594_v24, 4  ;;  %v573_v34 = vrot.slane %v572_v25, 4  ;;  %v586_v35 = vor.u32 %v585_v26, %v582_v21  ;;  %v544_v55 = vld [vmem:[%s2491_s20 + $0x30] sm:$0xf] }
  0x38   : > { %2086 = vmatprep.mubr.msk.bf16.mxu0 %vm350_vm1, %v2242_v53  ;;  %v599_v36 = vrot.slane %v597_v27, 5  ;;  %v564_v38 = vsel %vm2497_vm4, %v559_v31, %v563_v9  ;;  %v605_v39 = vrot.slane %v603_v28, 5  ;;  %v808_v16 = vsel %vm363_vm0, %v2516_v10, 0  ;;  %v545_v60 = vld [vmem:[%s2491_s20 + $0x34] sm:$0x1] }
  0x39   : > { %v578_v41 = vsel %vm2497_vm4, %v573_v34, %v577_v17  ;;  %v587_v42 = vrot.slane %v586_v35, 4  ;;  %v608_v15 = vshrl.u32 %v540_v40, 16  ;;  %v611_v49 = vshll.u32 %v540_v40, 16  ;;  %v2245_v62 = vld [vmem:[%s2491_s20 + $0x38] ss:$8 sps:$4 sm:$0xff]  }
  0x3a   : > { %v600_v43 = vor.u32 %v599_v36, %v596_v33  ;;  %v1878_v47 = vcombine.low %v564_v38, %v578_v41  ;;  %v617_v10 = vshll.u32 %v541_v45, 16  ;;  %v622_v50 = vshrl.u32 %v542_v46, 16  ;;  %v546_v0 = vld [vmem:[%s2491_s20 + $0x38] sm:$0xf]  ;;  %v547_v2 = vld [vmem:[%s2491_s20 + $0x3c] sm:$0x1] }
  0x3b   : > { %v592_v51 = vsel %vm2497_vm4, %v587_v42, %v591_v32  ;;  %v610_v53 = vrot.slane %v608_v15, 4  ;;  %v625_v54 = vshll.u32 %v542_v46, 16  ;;  %v613_v56 = vrot.slane %v611_v49, 5  ;;  %v2246_v14 = vld [vmem:[%s2439_s26 + $0x8] ss:$8 sps:$4 sm:$0xff]  }
  0x3c   : > { %v601_v52 = vrot.slane %v600_v43, 4  ;;  %2046 = vmatprep.mubr.msk.bf16.mxu1 %vm350_vm1, %v1878_v47  ;;  %v619_v57 = vrot.slane %v617_v10, 5  ;;  %v624_v58 = vrot.slane %v622_v50, 4  ;;  %v631_v59 = vshll.u32 %v543_v48, 16  ;;  %v2247_v35 = vld [vmem:[%s2439_s26 + $0x18] ss:$8 sps:$4 sm:$0xff]  }
  0x3d   : > { %v627_v63 = vrot.slane %v625_v54, 5  ;;  %v636_v4 = vshrl.u32 %v544_v55, 16  ;;  %v614_v6 = vor.u32 %v613_v56, %v610_v53  ;;  %v639_v8 = vshll.u32 %v544_v55, 16  ;;  %v1948_v40 = vld [vmem:[%s2491_s20 + $0xc] sm:$0x1] }
  0x3e   : > { %v606_v61 = vsel %vm2497_vm4, %v601_v52, %v605_v39  ;;  %v633_v7 = vrot.slane %v631_v59, 5  ;;  %v645_v12 = vshll.u32 %v545_v60, 16  ;;  %v650_v13 = vshrl.u32 %v546_v0, 16  ;;  %v2250_v39 = vld [vmem:[%s2439_s26 + $0x28] ss:$8 sps:$4 sm:$0xff]  }
  0x3f   : > { %2087 = vmatmul.mubr.msk.bf16.vlgmr.msra.gmra.mrb[0].mxu0 %vm350_vm1, %v2243_v29  ;;  %v1879_v5 = vcombine.low %v592_v51, %v606_v61  ;;  %v628_v9 = vor.u32 %v627_v63, %v624_v58  ;;  %v638_v11 = vrot.slane %v636_v4, 4  ;;  %v615_v17 = vrot.slane %v614_v6, 4  ;;  %v1949_v41 = vld [vmem:[%s2491_s20 + $0x10] sm:$0xf]  ;;  %v1950_v42 = vld [vmem:[%s2491_s20 + $0x14] sm:$0x1] }
  0x40   : > { %2095 = vmatpush3.bf16.msra.mxu0 %v1394_v30  ;;  %2090 = vmatprep.mubr.msk.bf16.mxu0 %vm350_vm1, %v2244_v37  ;;  %v641_v18 = vrot.slane %v639_v8, 5  ;;  %v653_v19 = vshll.u32 %v546_v0, 16  ;;  %v659_v20 = vshll.u32 %v547_v2, 16  ;;  %v652_v22 = vrot.slane %v650_v13, 4  ;;  %v2248_v37 = vld [vmem:[%s2463_s16] ss:$8 sps:$4 sm:$0xff]  }
  0x41   : > { %2189 = vmatprep.subr.msk.bf16.mxu0 %vm363_vm0, %v2575_v23  ;;  %2047 = vmatmul.mubr.msk.bf16.vlgmr.msra.gmra.mrb[0].mxu1 %vm350_vm1, %v1879_v5  ;;  %v629_v21 = vrot.slane %v628_v9, 4  ;;  %v620_v24 = vsel %vm2497_vm4, %v615_v17, %v619_v57  ;;  %v647_v26 = vrot.slane %v645_v12, 5  ;;  %v1624_v34 = vsel %vm363_vm0, %v2575_v23, 0  ;;  %v1951_v48 = vld [vmem:[%s2491_s20 + $0x18] sm:$0xf] }
  0x42   : > { %2055 = vmatpush3.bf16.msra.mxu1 %v808_v16  ;;  %v642_v25 = vor.u32 %v641_v18, %v638_v11  ;;  %v655_v27 = vrot.slane %v653_v19, 5  ;;  %v661_v32 = vrot.slane %v659_v20, 5  ;;  %v1947_v16 = vld [vmem:[%s2491_s20 + $0x8] sm:$0xf]  ;;  %v1495_v23 = vshll.u32 %v1948_v40, 16 }
  0x43   : > { %2185 = vmatprep.subr.msk.bf16.mxu1 %vm363_vm0, %v2412_v1  ;;  %v634_v28 = vsel %vm2497_vm4, %v629_v21, %v633_v7  ;;  %v1486_v43 = vshrl.u32 %v1947_v16, 16  ;;  %v1489_v45 = vshll.u32 %v1947_v16, 16  ;;  %v1500_v46 = vshrl.u32 %v1949_v41, 16  ;;  %v1952_v50 = vld [vmem:[%s2491_s20 + $0x1c] sm:$0x1] }
  0x44   : > { %v1880_v29 = vcombine.low %v620_v24, %v634_v28  ;;  %v643_v30 = vrot.slane %v642_v25, 4  ;;  %v656_v31 = vor.u32 %v655_v27, %v652_v22  ;;  %v1503_v15 = vshll.u32 %v1949_v41, 16  ;;  %v1953_v51 = vld [vmem:[%s2491_s20 + $0x20] sm:$0xf]  ;;  %v2249_v52 = vld [vmem:[%s2463_s16 + $0x10] ss:$8 sps:$4 sm:$0xff]  }
  0x45   : > { %v1509_v47 = vshll.u32 %v1950_v42, 16  ;;  %v1488_v49 = vrot.slane %v1486_v43, 4  ;;  %v1491_v10 = vrot.slane %v1489_v45, 5  ;;  %v2251_v53 = vld [vmem:[%s2439_s26 + $0x38] ss:$8 sps:$4 sm:$0xff]   ;;  %v1497_v54 = vrot.slane %v1495_v23, 5 }
  0x46   : > { %2050 = vmatprep.mubr.msk.bf16.mxu1 %vm350_vm1, %v1880_v29  ;;  %v648_v1 = vsel %vm2497_vm4, %v643_v30, %v647_v26  ;;  %v657_v33 = vrot.slane %v656_v31, 4  ;;  %v1502_v55 = vrot.slane %v1500_v46, 4  ;;  %v1505_v56 = vrot.slane %v1503_v15, 5  ;;  %v1954_v58 = vld [vmem:[%s2491_s20 + $0x24] sm:$0x1]  ;;  %s287_s26 = sand.u32 1, %s2310_s22  }
  0x47   : > { %2091 = vmatmul.mubr.msk.bf16.gmra.mrb[4].mxu0 %vm350_vm1, %v2245_v62  ;;  %v1511_v57 = vrot.slane %v1509_v47, 5  ;;  %v1492_v59 = vor.u32 %v1491_v10, %v1488_v49  ;;  %v1514_v60 = vshrl.u32 %v1951_v48, 16  ;;  %v1517_v61 = vshll.u32 %v1951_v48, 16  ;;  %v2252_v5 = vld [vmem:[%s2463_s16 + $0x20] ss:$8 sps:$4 sm:$0xff]  }
  0x48   : > { %2096 = vmatprep.mubr.msk.bf16.mxu0 %vm350_vm1, %v2246_v14  ;;  %v662_v36 = vsel %vm2497_vm4, %v657_v33, %v661_v32  ;;  %v1523_v62 = vshll.u32 %v1952_v50, 16  ;;  %v1506_v63 = vor.u32 %v1505_v56, %v1502_v55  ;;  %v1528_v0 = vshrl.u32 %v1953_v51, 16  ;;  %v1955_v17 = vld [vmem:[%s2491_s20 + $0x28] sm:$0xf]  ;;  %v1956_v20 = vld [vmem:[%s2491_s20 + $0x2c] sm:$0x1] }
  0x49   : > { %v1881_v38 = vcombine.low %v648_v1, %v662_v36  ;;  %v1531_v2 = vshll.u32 %v1953_v51, 16  ;;  %v1537_v4 = vshll.u32 %v1954_v58, 16  ;;  %v1493_v6 = vrot.slane %v1492_v59, 4  ;;  %v1957_v21 = vld [vmem:[%s2491_s20 + $0x30] sm:$0xf] }
  0x4a   : > { %v1516_v7 = vrot.slane %v1514_v60, 4  ;;  %v1519_v8 = vrot.slane %v1517_v61, 5  ;;  %v1525_v9 = vrot.slane %v1523_v62, 5  ;;  %v1507_v11 = vrot.slane %v1506_v63, 4  ;;  %v1958_v22 = vld [vmem:[%s2491_s20 + $0x34] sm:$0x1] }
  0x4b   : > { %2051 = vmatmul.mubr.msk.bf16.gmra.mrb[4].mxu1 %vm350_vm1, %v1881_v38  ;;  %v1530_v12 = vrot.slane %v1528_v0, 4  ;;  %v1533_v13 = vrot.slane %v1531_v2, 5  ;;  %v1539_v14 = vrot.slane %v1537_v4, 5  ;;  %v1498_v18 = vsel %vm2497_vm4, %v1493_v6, %v1497_v54  ;;  %v2253_v32 = vld [vmem:[%s2463_s16 + $0x30] ss:$8 sps:$4 sm:$0xff]   ;;  %s1978_s16 = sshll.u32 %s2379_s25, 9 }
  0x4c   : > { %2056 = vmatprep.mubr.msk.bf16.mxu1 %vm350_vm1, %v2248_v37  ;;  %v1520_v19 = vor.u32 %v1519_v8, %v1516_v7  ;;  %v1512_v24 = vsel %vm2497_vm4, %v1507_v11, %v1511_v57  ;;  %v1542_v26 = vshrl.u32 %v1955_v17, 16  ;;  %v1545_v27 = vshll.u32 %v1955_v17, 16  ;;  %v1959_v36 = vld [vmem:[%s2491_s20 + $0x38] sm:$0xf]  ;;  %v1960_v16 = vld [vmem:[%s2491_s20 + $0x3c] sm:$0x1]  ;;  %s2692_s18 = scalar_lea.hbm %s2751_s6, %s1978_s16 }
  0x4d   : > { %v1534_v25 = vor.u32 %v1533_v13, %v1530_v12  ;;  %v1964_v28 = vcombine.low %v1498_v18, %v1512_v24  ;;  %v1551_v30 = vshll.u32 %v1956_v20, 16  ;;  %v1556_v31 = vshrl.u32 %v1957_v21, 16  ;;  %v1961_v43 = vld [vmem:[%s2491_s20 + $0x40] sm:$0xf]  ;;  %v1962_v45 = vld [vmem:[%s2491_s20 + $0x44] sm:$0x1] }
  0x4e   : > { %v1521_v29 = vrot.slane %v1520_v19, 4  ;;  %v1544_v33 = vrot.slane %v1542_v26, 4  ;;  %v1570_v23 = vshrl.u32 %v1959_v36, 16  ;;  %v2254_v15 = vld [vmem:[%s2448_s9 + $0x20] ss:$8 sps:$4 sm:$0xff]   ;;  %v1573_v48 = vshll.u32 %v1959_v36, 16 }
  0x4f   : > { %2097 = vmatmul.mubr.msk.bf16.vlgmr.msra.gmra.mrb[0].mxu0 %vm350_vm1, %v2247_v35  ;;  %v1535_v1 = vrot.slane %v1534_v25, 4  ;;  %v1559_v35 = vshll.u32 %v1957_v21, 16  ;;  %v1553_v37 = vrot.slane %v1551_v30, 5  ;;  %v1558_v38 = vrot.slane %v1556_v31, 4  ;;  %v2255_v8 = vld [vmem:[%s2448_s9 + $0x30] ss:$8 sps:$4 sm:$0xff]  }
  0x50   : > { %2105 = vmatpush3.bf16.msra.mxu0 %v1624_v34  ;;  %2100 = vmatprep.mubr.msk.bf16.mxu0 %vm350_vm1, %v2250_v39  ;;  %v1547_v34 = vrot.slane %v1545_v27, 5  ;;  %v1565_v39 = vshll.u32 %v1958_v22, 16  ;;  %v1579_v49 = vshll.u32 %v1960_v16, 16  ;;  %v1572_v51 = vrot.slane %v1570_v23, 4  ;;  %v1972_v18 = vld [vmem:[%s2750_s5] ss:$0 sm:$0xff] }
  0x51   : > { %v1540_v40 = vsel %vm2497_vm4, %v1535_v1, %v1539_v14  ;;  %v1561_v42 = vrot.slane %v1559_v35, 5  ;;  %v1587_v54 = vshll.u32 %v1961_v43, 16  ;;  %v1593_v55 = vshll.u32 %v1962_v45, 16  ;;  %s1855_s9 = sshll.u32 %s287_s26, 5  ;;  %s2704_s25 = scalar_lea.sflag [#allocation3], %s287_s26 }
  0x52   : > { %v1548_v41 = vor.u32 %v1547_v34, %v1544_v33  ;;  %v1567_v47 = vrot.slane %v1565_v39, 5  ;;  %v1581_v60 = vrot.slane %v1579_v49, 5  ;;  %s2675_s15 = scalar_lea.vmem [#allocation2], %s1855_s9 }
  0x53   : > { %2057 = vmatmul.mubr.msk.bf16.vlgmr.msra.gmra.mrb[0].mxu1 %vm350_vm1, %v2249_v52  ;;  %v1562_v50 = vor.u32 %v1561_v42, %v1558_v38  ;;  %v1584_v52 = vshrl.u32 %v1961_v43, 16  ;;  %v1589_v61 = vrot.slane %v1587_v54, 5  ;;  %v1595_v4 = vrot.slane %v1593_v55, 5  ;;  %s1753_s17 = sshll.u32 %s2675_s15, 4  ;;  %s2694_s17 = int_to_ptr.vmem [resolvable:$true] %s1753_s17 }
  0x54   : > { %2115 = vmatpush3.bf16.msra.mxu1 %v2421_v3  ;;  %2060 = vmatprep.mubr.msk.bf16.mxu1 %vm350_vm1, %v2252_v5  ;;  %v1526_v3 = vsel %vm2497_vm4, %v1521_v29, %v1525_v9  ;;  %v1549_v10 = vrot.slane %v1548_v41, 4  ;;  %s2256_s28 = scalar_lea.vmem %s2694_s17, 512  ;;  %p2263_p0 = scmp.lt.s32.totalorder %s2694_s17, %s2261_s10 }
  0x55   : > { %v1965_v46 = vcombine.low %v1526_v3, %v1540_v40  ;;  %v1563_v57 = vrot.slane %v1562_v50, 4  ;;  %v1586_v58 = vrot.slane %v1584_v52, 4  ;;  %p2257_p11 = scmp.ne.s32.totalorder %s2694_s17, %s2256_s28  ;;  %p2264_p1 = scmp.lt.s32.totalorder %s2262_s11, %s2256_s28 }
  0x56   : > { %v1554_v56 = vsel %vm2497_vm4, %v1549_v10, %v1553_v37 }
  0x57   : > { %2101 = vmatmul.mubr.msk.bf16.gmra.mrb[4].mxu0 %vm350_vm1, %v2251_v53  ;;  %v1575_v53 = vrot.slane %v1573_v48, 5  ;;  %v1568_v62 = vsel %vm2497_vm4, %v1563_v57, %v1567_v47  ;;  %v1590_v2 = vor.u32 %v1589_v61, %v1586_v58  ;;  %p2258_p12 = pnand %p2257_p11, %p2396_p5  ;;  %p2265_p2 = por %p2264_p1, %p2263_p0 }
  0x58   : > { %2106 = vmatprep.mubr.msk.bf16.mxu0 %vm350_vm1, %v1964_v28  ;;  %v1966_v63 = vcombine.low %v1554_v56, %v1568_v62 }
  0x59   : > { %v1576_v59 = vor.u32 %v1575_v53, %v1572_v51  ;;  %v1591_v6 = vrot.slane %v1590_v2, 4  ;;  %p2259_p13 = pneg %p2258_p12 }
  0x5b   : > { %2061 = vmatmul.mubr.msk.bf16.gmra.mrb[4].mxu1 %vm350_vm1, %v2253_v32  ;;  %v1577_v0 = vrot.slane %v1576_v59, 4  ;;  %v1596_v7 = vsel %vm2497_vm4, %v1591_v6, %v1595_v4  ;;  %p2266_p3 = pnand %p2265_p2, %p2259_p13 }
  0x5c   : > { %2070 = vmatprep.mubr.msk.bf16.mxu1 %vm350_vm1, %v2254_v15 }
  0x5d   : > { %v1582_v5 = vsel %vm2497_vm4, %v1577_v0, %v1581_v60 }
  0x5e   : > { %v1967_v9 = vcombine.low %v1582_v5, %v1596_v7 }
  0x5f   : > { %2107 = vmatmul.mubr.msk.bf16.vlgmr.msra.gmra.mrb[0].mxu0 %vm350_vm1, %v1965_v46 }
  0x60   : > { %2110 = vmatprep.mubr.msk.bf16.mxu0 %vm350_vm1, %v1966_v63 }
  0x67   : > { %2111 = vmatmul.mubr.msk.bf16.gmra.mrb[4].mxu0 %vm350_vm1, %v1967_v9  ;;  %2071 = vmatmul.mubr.msk.bf16.vlgmr.msra.gmra.mrb[4].mxu1 %vm350_vm1, %v2255_v8 }
 0x126   : > { %v2058_v11 = vpop.f32.mrb[0].mxu1 }
 0x127   : > { %v844_v12 = vpop.f32.mrb[1].mxu1 }
 0x128   : > { %v2059_v13 = vpop.f32.mrb[2].mxu1 }
 0x129   : > { %v847_v14 = vpop.f32.mrb[3].mxu1 }
 0x132   : > { %v2108_v17 = vpop.f32.mrb[0].mxu0 }
 0x133   : > { %v2116_v19 = vadd.f32 %v2108_v17, %v2058_v11  ;;  %v1660_v44 = vpop.f32.mrb[1].mxu0 }
 0x134   : > { %v2117_v20 = vadd.f32 %v1660_v44, %v844_v12  ;;  %v2109_v21 = vpop.f32.mrb[2].mxu0 }
 0x135   : > { %v1708_v22 = vadd.f32 %v2116_v19, %v1972_v18  ;;  %v2118_v24 = vadd.f32 %v2109_v21, %v2059_v13  ;;  %v1663_v25 = vpop.f32.mrb[3].mxu0 }
 0x136   : > { %v1706_v26 = vadd.f32 %v2117_v20, %v1972_v18  ;;  %v2119_v27 = vadd.f32 %v1663_v25, %v847_v14 }
 0x137   : > { %v1716_v28 = vmax.f32 %v1708_v22, 0.0  ;;  %v1709_v29 = vadd.f32 %v2118_v24, %v1972_v18 }
 0x138   : > { %v1714_v30 = vmax.f32 %v1706_v26, 0.0  ;;  %v1707_v31 = vadd.f32 %v2119_v27, %v1972_v18 }
 0x139   : > { %v1724_v32 = vpack.c.bf16 %v1716_v28, %v1716_v28  ;;  %v1717_v1 = vmax.f32 %v1709_v29, 0.0 }
 0x13a   : > { %v1722_v33 = vpack.c.bf16 %v1714_v30, %v1714_v30  ;;  %v1715_v34 = vmax.f32 %v1707_v31, 0.0  ;;  %v2112_v3 = vpop.f32.mrb[4].mxu0  ;;  %v2072_v38 = vpop.f32.mrb[4].mxu1 }
 0x13b   : > { %1733 = vst.msk [vmem:[%s2675_s15 + $0x8] sm:$0xf] %vm1730_vm5, %v1724_v32  ;;  %v1725_v35 = vpack.c.bf16 %v1717_v1, %v1717_v1  ;;  %v1676_v37 = vpop.f32.mrb[5].mxu0  ;;  %v2120_v16 = vadd.f32 %v2112_v3, %v2072_v38  ;;  %v978_v40 = vpop.f32.mrb[5].mxu1 }
 0x13c   : > { %1731 = vst.msk [vmem:[%s2675_s15] sm:$0xf] %vm1730_vm5, %v1722_v33  ;;  %v1723_v36 = vpack.c.bf16 %v1715_v34, %v1715_v34  ;;  %v2113_v39 = vpop.f32.mrb[6].mxu0  ;;  %v2121_v42 = vadd.f32 %v1676_v37, %v978_v40  ;;  %v2073_v43 = vpop.f32.mrb[6].mxu1 }
 0x13d   : > { %1734 = vst.msk [vmem:[%s2675_s15 + $0xc] sm:$0xf] %vm1730_vm5, %v1725_v35  ;;  %v1679_v41 = vpop.f32.mrb[7].mxu0  ;;  %v1712_v45 = vadd.f32 %v2120_v16, %v1972_v18  ;;  %v2122_v23 = vadd.f32 %v2113_v39, %v2073_v43  ;;  %v981_v46 = vpop.f32.mrb[7].mxu1 }
 0x13e   : > { %1732 = vst.msk [vmem:[%s2675_s15 + $0x4] sm:$0xf] %vm1730_vm5, %v1723_v36  ;;  %v1710_v15 = vadd.f32 %v2121_v42, %v1972_v18  ;;  %v2123_v47 = vadd.f32 %v1679_v41, %v981_v46 }
 0x13f   : > { %v1720_v48 = vmax.f32 %v1712_v45, 0.0  ;;  %v1713_v49 = vadd.f32 %v2122_v23, %v1972_v18 }
 0x140   : > { %v1718_v10 = vmax.f32 %v1710_v15, 0.0  ;;  %v1711_v50 = vadd.f32 %v2123_v47, %v1972_v18 }
 0x141   : > { %v1728_v51 = vpack.c.bf16 %v1720_v48, %v1720_v48  ;;  %v1721_v52 = vmax.f32 %v1713_v49, 0.0 }
 0x142   : > { %v1726_v53 = vpack.c.bf16 %v1718_v10, %v1718_v10  ;;  %v1719_v54 = vmax.f32 %v1711_v50, 0.0 }
 0x143   : > { %1737 = vst.msk [vmem:[%s2675_s15 + $0x18] sm:$0xf] %vm1730_vm5, %v1728_v51  ;;  %v1729_v55 = vpack.c.bf16 %v1721_v52, %v1721_v52 }
 0x144   : > { %1735 = vst.msk [vmem:[%s2675_s15 + $0x10] sm:$0xf] %vm1730_vm5, %v1726_v53  ;;  %v1727_v56 = vpack.c.bf16 %v1719_v54, %v1719_v54 }
 0x145   : > { %1738 = vst.msk [vmem:[%s2675_s15 + $0x1c] sm:$0xf] %vm1730_vm5, %v1729_v55 }
 0x146   : > { %1736 = vst.msk [vmem:[%s2675_s15 + $0x14] sm:$0xf] %vm1730_vm5, %v1727_v56 }
 0x147   : > { %2269 = shalt.err (!%p2266_p3)
}
 0x148   : > { %s2270_s12 = scalar_lea.hbm %s2692_s18, 512  ;;  %s2274_s14 = scalar_lea.hbm %s2751_s6, 1024 }
 0x149   : > { %p2271_p4 = scmp.ne.s32.totalorder %s2692_s18, %s2270_s12  ;;  %p2275_p9 = scmp.lt.u32.totalorder %s2692_s18, %s2751_s6 }
 0x14a   : > { %p2276_p10 = scmp.lt.u32.totalorder %s2274_s14, %s2270_s12  ;;  %p2278_p12 = scmp.lt.u32.totalorder %s2270_s12, %s2692_s18 }
 0x14b   : > { %p2272_p7 = pnand %p2271_p4, %p2396_p5 }
 0x14c   : > { %p2277_p11 = por %p2276_p10, %p2275_p9 }
 0x14d   : > { %p2273_p8 = pneg %p2272_p7 }
 0x14e   : > { %p2279_p13 = por %p2278_p12, %p2277_p11 }
 0x150   : > { %p2280_p0 = pnand %p2279_p13, %p2273_p8 }
 0x152   : > { %2283 = shalt.err (!%p2280_p0)
}
 0x153   : > { %s2321_s16 = smov 64   ;;  %s2322_s19 = smov 4  }
 0x154   : > { %2191 = dma.vmem_to_hbm [thread:$0]  (%p2396_p5), %s2694_s17, 512, %s2692_s18, %s2704_s25, %s2321_s16, %s2321_s16, %s2322_s19  }
 0x155 PF: > { %p2197_p1 = scmp.ge.s32.totalorder %s2318_s24, 2  ;;  %s1768_s20 = sand.u32 1, %s2306_s21  }
 0x156   : > { %s1769_s28 = scalar_lea.sflag [#allocation3], %s1768_s20 }
 0x157   : > { %p2194_p2 = pnand %p2197_p1, %p2400_p6 }
 0x159   : > { %2301 = dma.done.wait (!%p2194_p2), %s1769_s28, 512  }
 0x15a   : > { %2303 = vsyncadd (!%p2194_p2), %s1769_s28, 4294966784  ;;  %p16_p3 = scmp.ge.s32.totalorder %s2383_s27, 4   ;;  %s2756_s21 = smov %s2310_s22 }
 0x15b   : > { %s2757_s22 = smov %s2314_s23  ;;  %s2758_s23 = smov %s2394_s30 }
 0x15c   : > { %s2759_s24 = smov %s2383_s27  ;;  %18 = sbr.rel (!%p16_p3) target bundleno = 3 (0x3), region = 98 }
 0x163   :  { %1774 = vsyncpa [#allocation3], 1 }
 0x164   :  { %1776 = vsyncpa [#allocation3 + $0x1], 1 }

</bundles_post_ra>
